<compile_context>
chip_gen: v6e
topology: v6e:2x2x1
jax: 0.10.0
libtpu: 0.0.40
codegen_flags: <defaults>
</compile_context>

<pallas_src>
import jax
import jax.numpy as jnp
from jax.experimental import pallas as pl
from jax.experimental.pallas import tpu as pltpu

IN_DIM = 132
H1_PAD = 256   # 200 padded up to a lane multiple
H2_PAD = 128   # 80 padded up to a lane multiple


def _round_up(n, m):
    return ((n + m - 1) // m) * m


def _pad_to(a, shape):
    return jnp.pad(a, [(0, s - d) for d, s in zip(a.shape, shape)])


def _q3_kernel(x_ref, w1_ref, b1_ref, w2_ref, b2_ref, w3_ref, b3_ref, o_ref):
    # fc1 + relu  (MXU, f32 accumulation)
    h1 = jnp.dot(x_ref[...], w1_ref[...], preferred_element_type=jnp.float32)
    h1 = jnp.maximum(h1 + b1_ref[...], 0.0)
    # fc2 + relu  (cast activations to the weight dtype so MXU operands match)
    h2 = jnp.dot(h1.astype(w2_ref.dtype), w2_ref[...],
                 preferred_element_type=jnp.float32)
    h2 = jnp.maximum(h2 + b2_ref[...], 0.0)
    # fc3: 1-wide output -> VPU multiply + XLU lane reduction (skip the MXU)
    h3 = jnp.sum(h2 * w3_ref[...], axis=-1, keepdims=True) + b3_ref[0, 0]
    o_ref[...] = h3.astype(o_ref.dtype)


def _prepare_params(params, use_bf16):
    """Pad hidden dims to lane multiples and (optionally) cast MXU weights to bf16."""
    w_dtype = jnp.bfloat16 if use_bf16 else jnp.float32
    w1 = _pad_to(params["w1"], (IN_DIM, H1_PAD)).astype(w_dtype)
    b1 = _pad_to(params["b1"], (1, H1_PAD)).astype(jnp.float32)
    w2 = _pad_to(params["w2"], (H1_PAD, H2_PAD)).astype(w_dtype)
    b2 = _pad_to(params["b2"], (1, H2_PAD)).astype(jnp.float32)
    # w3 (80, 1) -> row vector (1, 128), kept f32 for the VPU reduce.
    w3 = _pad_to(params["w3"].reshape(1, -1), (1, H2_PAD)).astype(jnp.float32)
    b3 = params["b3"].reshape(1, 1).astype(jnp.float32)
    return w1, b1, w2, b2, w3, b3


def q3_net_forward(x, params, *, use_bf16=True, tile_b=1024):
    """x: (B, 132) float32. params: dict of w1,b1,w2,b2,w3,b3 (w stored (in, out))."""
    B = x.shape[0]
    w1, b1, w2, b2, w3, b3 = _prepare_params(params, use_bf16)

    # Tile the batch: at least 256 rows (fills the 256-row MXU on v6e/v7x),
    # capped at `tile_b` (default 1024 keeps x(x2 buffers)+h1+h2 well under the
    # ~32 MiB scoped VMEM budget on v5e/v6e/v7x).
    tile_b = max(256, min(tile_b, _round_up(B, 256)))
    B_pad = _round_up(B, tile_b)

    x_p = x.astype(jnp.bfloat16) if use_bf16 else x.astype(jnp.float32)
    if B_pad != B:
        x_p = jnp.pad(x_p, ((0, B_pad - B), (0, 0)))

    const_map = lambda i: (0, 0)   # weights/biases resident across the whole grid
    out = pl.pallas_call(
        _q3_kernel,
        out_shape=jax.ShapeDtypeStruct((B_pad, 1), jnp.float32),
        grid=(B_pad // tile_b,),
        in_specs=[
            pl.BlockSpec((tile_b, IN_DIM), lambda i: (i, 0)),   # x: streamed per tile
            pl.BlockSpec(w1.shape, const_map),
            pl.BlockSpec(b1.shape, const_map),
            pl.BlockSpec(w2.shape, const_map),
            pl.BlockSpec(b2.shape, const_map),
            pl.BlockSpec(w3.shape, const_map),
            pl.BlockSpec(memory_space=pltpu.MemorySpace.SMEM),  # b3 scalar
        ],
        out_specs=pl.BlockSpec((tile_b, 1), lambda i: (i, 0)),
        compiler_params=pltpu.CompilerParams(
            dimension_semantics=("parallel",),   # megacore sharding on v7x
            vmem_limit_bytes=32 << 20,
        ),
    )(x_p, w1, b1, w2, b2, w3, b3)
    return out[:B]


def init_params(key):
    """Deterministic init mimicking PyTorch nn.Linear default (U[-1/sqrt(fan_in), +]).

    Weights are stored as (in_features, out_features), i.e. already transposed
    relative to PyTorch's (out, in) layout, so the kernel computes x @ W + b.
    """
    dims = [(132, 200), (200, 80), (80, 1)]
    params = {}
    keys = jax.random.split(key, 2 * len(dims))
    for i, (fan_in, fan_out) in enumerate(dims):
        bound = 1.0 / (fan_in ** 0.5)
        w = jax.random.uniform(keys[2 * i], (fan_in, fan_out),
                               minval=-bound, maxval=bound, dtype=jnp.float32)
        b = jax.random.uniform(keys[2 * i + 1], (1, fan_out),
                               minval=-bound, maxval=bound, dtype=jnp.float32)
        params[f"w{i + 1}"] = w
        params[f"b{i + 1}"] = b
    return params


def _reference_forward(x, params):
    h = jnp.maximum(x @ params["w1"] + params["b1"], 0.0)
    h = jnp.maximum(h @ params["w2"] + params["b2"], 0.0)
    return h @ params["w3"] + params["b3"]


if __name__ == "__main__":
    key = jax.random.PRNGKey(0)
    k_x, k_p = jax.random.split(key)
    B = 8
    x = jax.random.normal(k_x, (B, 132), dtype=jnp.float32)
    params = init_params(k_p)

    ref = _reference_forward(x, params)

    # Exact-semantics path (f32 MXU operands): tight tolerance vs the reference.
    out_f32 = jax.block_until_ready(q3_net_forward(x, params, use_bf16=False))
    assert out_f32.shape == (B, 1), out_f32.shape
    assert jnp.allclose(out_f32, ref, atol=1e-4, rtol=1e-4), "f32 path mismatch"

    # Fast path (bf16 MXU operands, f32 accumulation): looser tolerance.
    out_bf16 = jax.block_until_ready(q3_net_forward(x, params, use_bf16=True))
    assert out_bf16.shape == (B, 1), out_bf16.shape
    assert jnp.allclose(out_bf16, ref, atol=3e-2, rtol=3e-2), "bf16 path mismatch"

    print("KERNEL_OK")
</pallas_src>

<mosaic_0001>
module attributes {stable_mosaic.version = 11 : i64} {
  func.func @_q3_kernel(%arg0: i32, %arg1: memref<256x132xf32, #tpu.memory_space<vmem>>, %arg2: memref<132x256xf32, #tpu.memory_space<vmem>>, %arg3: memref<1x256xf32, #tpu.memory_space<vmem>>, %arg4: memref<256x128xf32, #tpu.memory_space<vmem>>, %arg5: memref<1x128xf32, #tpu.memory_space<vmem>>, %arg6: memref<1x128xf32, #tpu.memory_space<vmem>>, %arg7: memref<1x1xf32, #tpu.memory_space<smem>>, %arg8: memref<256x1xf32, #tpu.memory_space<vmem>>) attributes {dimension_semantics = [#tpu.dimension_semantics<parallel>], iteration_bounds = array<i64: 1>, scalar_prefetch = 0 : i64, scratch_operands = 0 : i64, tpu.core_type = #tpu.core_type<tc>, window_params = [{transform_indices = @transform_0, window_bounds = array<i64: 256, 132>}, {pipeline_mode = #tpu.pipeline_mode<synchronous>, transform_indices = @transform_1, window_bounds = array<i64: 132, 256>}, {pipeline_mode = #tpu.pipeline_mode<synchronous>, transform_indices = @transform_2, window_bounds = array<i64: 1, 256>}, {pipeline_mode = #tpu.pipeline_mode<synchronous>, transform_indices = @transform_3, window_bounds = array<i64: 256, 128>}, {pipeline_mode = #tpu.pipeline_mode<synchronous>, transform_indices = @transform_4, window_bounds = array<i64: 1, 128>}, {pipeline_mode = #tpu.pipeline_mode<synchronous>, transform_indices = @transform_5, window_bounds = array<i64: 1, 128>}, {transform_indices = @transform_6, window_bounds = array<i64: 1, 1>}, {transform_indices = @transform_7, window_bounds = array<i64: 256, 1>}]} {
    %c0 = arith.constant 0 : index
    %c0_0 = arith.constant 0 : index
    %0 = vector.load %arg1[%c0, %c0_0] : memref<256x132xf32, #tpu.memory_space<vmem>>, vector<256x132xf32>
    %c0_1 = arith.constant 0 : index
    %c0_2 = arith.constant 0 : index
    %1 = vector.load %arg2[%c0_1, %c0_2] : memref<132x256xf32, #tpu.memory_space<vmem>>, vector<132x256xf32>
    %cst = arith.constant dense<0.000000e+00> : vector<256x256xf32>
    %2 = tpu.matmul %0, %1, %cst {dimension_numbers = #tpu.dot_dimension_numbers<[1], [0], [0], [1], [0, 0, 1, 1], [], []>} : vector<256x132xf32>, vector<132x256xf32>, vector<256x256xf32> -> vector<256x256xf32>
    %c0_3 = arith.constant 0 : index
    %c0_4 = arith.constant 0 : index
    %3 = vector.load %arg3[%c0_3, %c0_4] : memref<1x256xf32, #tpu.memory_space<vmem>>, vector<1x256xf32>
    %4 = vector.broadcast %3 : vector<1x256xf32> to vector<256x256xf32>
    %5 = arith.addf %2, %4 : vector<256x256xf32>
    %cst_5 = arith.constant 0.000000e+00 : f32
    %6 = vector.broadcast %cst_5 : f32 to vector<256x256xf32>
    %7 = arith.maximumf %5, %6 : vector<256x256xf32>
    %c0_6 = arith.constant 0 : index
    %c0_7 = arith.constant 0 : index
    %8 = vector.load %arg4[%c0_6, %c0_7] : memref<256x128xf32, #tpu.memory_space<vmem>>, vector<256x128xf32>
    %cst_8 = arith.constant dense<0.000000e+00> : vector<256x128xf32>
    %9 = tpu.matmul %7, %8, %cst_8 {dimension_numbers = #tpu.dot_dimension_numbers<[1], [0], [0], [1], [0, 0, 1, 1], [], []>} : vector<256x256xf32>, vector<256x128xf32>, vector<256x128xf32> -> vector<256x128xf32>
    %c0_9 = arith.constant 0 : index
    %c0_10 = arith.constant 0 : index
    %10 = vector.load %arg5[%c0_9, %c0_10] : memref<1x128xf32, #tpu.memory_space<vmem>>, vector<1x128xf32>
    %11 = vector.broadcast %10 : vector<1x128xf32> to vector<256x128xf32>
    %12 = arith.addf %9, %11 : vector<256x128xf32>
    %cst_11 = arith.constant 0.000000e+00 : f32
    %13 = vector.broadcast %cst_11 : f32 to vector<256x128xf32>
    %14 = arith.maximumf %12, %13 : vector<256x128xf32>
    %c0_12 = arith.constant 0 : index
    %c0_13 = arith.constant 0 : index
    %15 = vector.load %arg6[%c0_12, %c0_13] : memref<1x128xf32, #tpu.memory_space<vmem>>, vector<1x128xf32>
    %16 = vector.broadcast %15 : vector<1x128xf32> to vector<256x128xf32>
    %17 = arith.mulf %14, %16 : vector<256x128xf32>
    %cst_14 = arith.constant dense<0.000000e+00> : vector<256xf32>
    %18 = vector.multi_reduction <add>, %17, %cst_14 [1] : vector<256x128xf32> to vector<256xf32>
    %19 = vector.shape_cast %18 : vector<256xf32> to vector<256x1xf32>
    %c0_15 = arith.constant 0 : index
    %c0_16 = arith.constant 0 : index
    %20 = memref.load %arg7[%c0_15, %c0_16] : memref<1x1xf32, #tpu.memory_space<smem>>
    %21 = vector.broadcast %20 : f32 to vector<256x1xf32>
    %22 = arith.addf %19, %21 : vector<256x1xf32>
    %c0_17 = arith.constant 0 : index
    %c0_18 = arith.constant 0 : index
    %23 = vector.load %arg8[%c0_17, %c0_18] : memref<256x1xf32, #tpu.memory_space<vmem>>, vector<256x1xf32>
    tpu.vector_store %arg8[%c0_17, %c0_18], %22 {strides = array<i32>} : memref<256x1xf32, #tpu.memory_space<vmem>>, vector<256x1xf32>,
    return
  }
  func.func @transform_0(%arg0: i32) -> (i32, i32) {
    %c0_i32 = arith.constant 0 : i32
    %c0_i32_0 = arith.constant 0 : i32
    return %arg0, %c0_i32 : i32, i32
  }
  func.func @transform_1(%arg0: i32) -> (i32, i32) {
    %c0_i32 = arith.constant 0 : i32
    %c0_i32_0 = arith.constant 0 : i32
    %c0_i32_1 = arith.constant 0 : i32
    return %c0_i32, %c0_i32_0 : i32, i32
  }
  func.func @transform_2(%arg0: i32) -> (i32, i32) {
    %c0_i32 = arith.constant 0 : i32
    %c0_i32_0 = arith.constant 0 : i32
    %c0_i32_1 = arith.constant 0 : i32
    return %c0_i32, %c0_i32_0 : i32, i32
  }
  func.func @transform_3(%arg0: i32) -> (i32, i32) {
    %c0_i32 = arith.constant 0 : i32
    %c0_i32_0 = arith.constant 0 : i32
    %c0_i32_1 = arith.constant 0 : i32
    return %c0_i32, %c0_i32_0 : i32, i32
  }
  func.func @transform_4(%arg0: i32) -> (i32, i32) {
    %c0_i32 = arith.constant 0 : i32
    %c0_i32_0 = arith.constant 0 : i32
    %c0_i32_1 = arith.constant 0 : i32
    return %c0_i32, %c0_i32_0 : i32, i32
  }
  func.func @transform_5(%arg0: i32) -> (i32, i32) {
    %c0_i32 = arith.constant 0 : i32
    %c0_i32_0 = arith.constant 0 : i32
    %c0_i32_1 = arith.constant 0 : i32
    return %c0_i32, %c0_i32_0 : i32, i32
  }
  func.func @transform_6(%arg0: i32) -> (i32, i32) {
    %c0_i32 = arith.constant 0 : i32
    %c0_i32_0 = arith.constant 0 : i32
    %c0_i32_1 = arith.constant 0 : i32
    return %c0_i32, %c0_i32_0 : i32, i32
  }
  func.func @transform_7(%arg0: i32) -> (i32, i32) {
    %c0_i32 = arith.constant 0 : i32
    %c0_i32_0 = arith.constant 0 : i32
    return %arg0, %c0_i32 : i32, i32
  }
}

</mosaic_0001>

<bundles_post_ra>
// kernel: tpu_custom_call.1
= control target key start
LH: loop header
LB: loop body
LE: loop exit
PB: predicated region body
PF: predicated region fallthrough
CT: control target
= control target key end

     0   :  { %vm137_vm0 = vcmask 31744   ;;  %vm234_vm1 = vcmask 1043456   ;;  %v1133_v37 = vmov 0.0   ;;  %vm995_vm2 = vcmask 7168   ;;  %s1970_s1 = inlined_call_operand.vmem [shape: f32[132,256], index: 1, kind: input, shape index: {}]   ;;  %s1971_s0 = inlined_call_operand.vmem [shape: f32[256,132], index: 0, kind: input, shape index: {}]   ;;  %s1972_s3 = inlined_call_operand.vmem [shape: f32[256,128], index: 3, kind: input, shape index: {}]   ;;  %s1973_s2 = inlined_call_operand.vmem [shape: f32[1,256], index: 2, kind: input, shape index: {}]   ;;  %s1974_s4 = inlined_call_operand.vmem [shape: f32[1,128], index: 4, kind: input, shape index: {}]   ;;  %s1975_s5 = inlined_call_operand.vmem [shape: f32[1,128], index: 5, kind: input, shape index: {}]   ;;  %s1976_s6 = inlined_call_operand.<no memory space> [shape: f32[1,1], index: 6, kind: input, shape index: {}]   ;;  %s1977_s7 = inlined_call_operand.vmem [shape: f32[256,1], index: 7, kind: output, shape index: {}]  }
   0x1   :  { %v122_v0 = vld [vmem:[%s1970_s1 + $0xf8] sm:$0xff]  ;;  %v121_v1 = vld [vmem:[%s1970_s1 + $0xf0] sm:$0xff]  ;;  %v120_v2 = vld [vmem:[%s1970_s1 + $0xe8] sm:$0xff]  ;;  %1068 = vmatprep.subr.mxu1 %v1133_v37 }
   0x2   :  { %241 = vmatprep.subr.mxu0 %v122_v0  ;;  %v119_v3 = vld [vmem:[%s1970_s1 + $0xe0] sm:$0xff]  ;;  %v118_v4 = vld [vmem:[%s1970_s1 + $0xd8] sm:$0xff]  ;;  %v117_v5 = vld [vmem:[%s1970_s1 + $0xd0] sm:$0xff] }
   0x3   :  { %242 = vmatpush1.msra.mxu0 %v121_v1  ;;  %v116_v6 = vld [vmem:[%s1970_s1 + $0xc8] sm:$0xff]  ;;  %v115_v7 = vld [vmem:[%s1970_s1 + $0xc0] sm:$0xff]  ;;  %v114_v8 = vld [vmem:[%s1970_s1 + $0xb8] sm:$0xff] }
   0x4   :  { %243 = vmatprep.subr.mxu0 %v120_v2  ;;  %v113_v9 = vld [vmem:[%s1970_s1 + $0xb0] sm:$0xff]  ;;  %v112_v10 = vld [vmem:[%s1970_s1 + $0xa8] sm:$0xff]  ;;  %v111_v11 = vld [vmem:[%s1970_s1 + $0xa0] sm:$0xff] }
   0x5   :  { %244 = vmatpush1.msra.mxu0 %v119_v3  ;;  %v110_v12 = vld [vmem:[%s1970_s1 + $0x98] sm:$0xff]  ;;  %v109_v13 = vld [vmem:[%s1970_s1 + $0x90] sm:$0xff]  ;;  %v28_v14 = vld [vmem:[%s1971_s0 + $0x8] sm:$0xff] }
   0x6   :  { %245 = vmatprep.subr.mxu0 %v118_v4  ;;  %v108_v15 = vld [vmem:[%s1970_s1 + $0x88] sm:$0xff]  ;;  %1034 = vmatprep.mubr.msk.f32.mxu0 %vm137_vm0, %v28_v14  ;;  %v107_v16 = vld [vmem:[%s1970_s1 + $0x80] sm:$0xff]  ;;  %v106_v17 = vld [vmem:[%s1970_s1 + $0x78] sm:$0xff] }
   0x7   :  { %246 = vmatpush1.msra.mxu0 %v117_v5  ;;  %v105_v18 = vld [vmem:[%s1970_s1 + $0x70] sm:$0xff]  ;;  %v104_v19 = vld [vmem:[%s1970_s1 + $0x68] sm:$0xff]  ;;  %v103_v20 = vld [vmem:[%s1970_s1 + $0x60] sm:$0xff] }
   0x8   :  { %247 = vmatprep.subr.mxu0 %v116_v6  ;;  %v102_v21 = vld [vmem:[%s1970_s1 + $0x58] sm:$0xff]  ;;  %v101_v22 = vld [vmem:[%s1970_s1 + $0x50] sm:$0xff]  ;;  %v100_v23 = vld [vmem:[%s1970_s1 + $0x48] sm:$0xff] }
   0x9   :  { %248 = vmatpush1.msra.mxu0 %v115_v7  ;;  %v99_v24 = vld [vmem:[%s1970_s1 + $0x40] sm:$0xff]  ;;  %v98_v25 = vld [vmem:[%s1970_s1 + $0x38] sm:$0xff]  ;;  %v97_v26 = vld [vmem:[%s1970_s1 + $0x30] sm:$0xff] }
   0xa   :  { %249 = vmatprep.subr.mxu0 %v114_v8  ;;  %v96_v27 = vld [vmem:[%s1970_s1 + $0x28] sm:$0xff]  ;;  %v95_v28 = vld [vmem:[%s1970_s1 + $0x20] sm:$0xff]  ;;  %v94_v29 = vld [vmem:[%s1970_s1 + $0x18] sm:$0xff] }
   0xb   :  { %250 = vmatpush1.msra.mxu0 %v113_v9  ;;  %v93_v30 = vld [vmem:[%s1970_s1 + $0x10] sm:$0xff]  ;;  %v92_v31 = vld [vmem:[%s1970_s1 + $0x8] sm:$0xff]  ;;  %v91_v32 = vld [vmem:[%s1970_s1] sm:$0xff] }
   0xc   :  { %251 = vmatprep.subr.mxu0 %v112_v10  ;;  %v124_v33 = vld [vmem:[%s1970_s1 + $0x108] sm:$0xf]  ;;  %v123_v34 = vld [vmem:[%s1970_s1 + $0x100] sm:$0xf]  ;;  %v577_v36 = vld [vmem:[%s1972_s3 + $0x78] sm:$0xff] }
   0xd   :  { %252 = vmatpush1.msra.mxu0 %v111_v11  ;;  %v27_v35 = vld [vmem:[%s1971_s0] sm:$0xff]  ;;  %v30_v38 = vld [vmem:[%s1971_s0 + $0x18] sm:$0xff]  ;;  %1100 = vmatpush1.msra.mxu1 %v577_v36  ;;  %v576_v39 = vld [vmem:[%s1972_s3 + $0x70] sm:$0xff] }
   0xe   :  { %253 = vmatprep.subr.mxu0 %v110_v12  ;;  %1069 = vmatprep.subr.mxu1 %v1133_v37  ;;  %v29_v40 = vld [vmem:[%s1971_s0 + $0x10] sm:$0xff]  ;;  %v32_v41 = vld [vmem:[%s1971_s0 + $0x28] sm:$0xff]  ;;  %v574_v43 = vld [vmem:[%s1972_s3 + $0x60] sm:$0xff] }
   0xf   :  { %254 = vmatpush1.msra.mxu0 %v109_v13  ;;  %v575_v42 = vld [vmem:[%s1972_s3 + $0x68] sm:$0xff]  ;;  %1101 = vmatpush1.msra.mxu1 %v576_v39  ;;  %v31_v44 = vld [vmem:[%s1971_s0 + $0x20] sm:$0xff]  ;;  %v34_v45 = vld [vmem:[%s1971_s0 + $0x38] sm:$0xff] }
  0x10   :  { %255 = vmatprep.subr.mxu0 %v108_v15  ;;  %1070 = vmatprep.subr.mxu1 %v1133_v37  ;;  %v573_v46 = vld [vmem:[%s1972_s3 + $0x58] sm:$0xff]  ;;  %v572_v47 = vld [vmem:[%s1972_s3 + $0x50] sm:$0xff]  ;;  %v36_v49 = vld [vmem:[%s1971_s0 + $0x48] sm:$0xff] }
  0x11   :  { %256 = vmatpush1.msra.mxu0 %v107_v16  ;;  %1102 = vmatpush1.msra.mxu1 %v575_v42  ;;  %v33_v48 = vld [vmem:[%s1971_s0 + $0x30] sm:$0xff]  ;;  %v571_v50 = vld [vmem:[%s1972_s3 + $0x48] sm:$0xff]  ;;  %v570_v51 = vld [vmem:[%s1972_s3 + $0x40] sm:$0xff] }
  0x12   :  { %257 = vmatprep.subr.mxu0 %v106_v17  ;;  %1071 = vmatprep.subr.mxu1 %v1133_v37  ;;  %v35_v52 = vld [vmem:[%s1971_s0 + $0x40] sm:$0xff]  ;;  %v38_v53 = vld [vmem:[%s1971_s0 + $0x58] sm:$0xff]  ;;  %v568_v55 = vld [vmem:[%s1972_s3 + $0x30] sm:$0xff] }
  0x13   :  { %258 = vmatpush1.msra.mxu0 %v105_v18  ;;  %1103 = vmatpush1.msra.mxu1 %v574_v43  ;;  %v569_v54 = vld [vmem:[%s1972_s3 + $0x38] sm:$0xff]  ;;  %v37_v56 = vld [vmem:[%s1971_s0 + $0x50] sm:$0xff]  ;;  %v40_v57 = vld [vmem:[%s1971_s0 + $0x68] sm:$0xff] }
  0x14   :  { %259 = vmatprep.subr.mxu0 %v104_v19  ;;  %1072 = vmatprep.subr.mxu1 %v1133_v37  ;;  %v567_v58 = vld [vmem:[%s1972_s3 + $0x28] sm:$0xff]  ;;  %v566_v59 = vld [vmem:[%s1972_s3 + $0x20] sm:$0xff]  ;;  %v42_v61 = vld [vmem:[%s1971_s0 + $0x78] sm:$0xff] }
  0x15   :  { %260 = vmatpush1.msra.mxu0 %v103_v20  ;;  %1104 = vmatpush1.msra.mxu1 %v573_v46  ;;  %v39_v60 = vld [vmem:[%s1971_s0 + $0x60] sm:$0xff]  ;;  %v565_v62 = vld [vmem:[%s1972_s3 + $0x18] sm:$0xff]  ;;  %v564_v63 = vld [vmem:[%s1972_s3 + $0x10] sm:$0xff] }
  0x16   :  { %261 = vmatprep.subr.mxu0 %v102_v21  ;;  %1073 = vmatprep.subr.mxu1 %v1133_v37  ;;  %v41_v0 = vld [vmem:[%s1971_s0 + $0x70] sm:$0xff]  ;;  %v44_v1 = vld [vmem:[%s1971_s0 + $0x88] sm:$0xff]  ;;  %v43_v3 = vld [vmem:[%s1971_s0 + $0x80] sm:$0xff] }
  0x17   :  { %262 = vmatpush1.msra.mxu0 %v101_v22  ;;  %1105 = vmatpush1.msra.mxu1 %v572_v47  ;;  %v563_v2 = vld [vmem:[%s1972_s3 + $0x8] sm:$0xff]  ;;  %v46_v4 = vld [vmem:[%s1971_s0 + $0x98] sm:$0xff]  ;;  %v562_v5 = vld [vmem:[%s1972_s3] sm:$0xff] }
  0x18   :  { %263 = vmatprep.subr.mxu0 %v100_v23  ;;  %1074 = vmatprep.subr.mxu1 %v1133_v37  ;;  %v593_v6 = vld [vmem:[%s1972_s3 + $0xf8] sm:$0xff]  ;;  %v45_v7 = vld [vmem:[%s1971_s0 + $0x90] sm:$0xff]  ;;  %v48_v8 = vld [vmem:[%s1971_s0 + $0xa8] sm:$0xff] }
  0x19   :  { %264 = vmatpush1.msra.mxu0 %v99_v24  ;;  %1106 = vmatpush1.msra.mxu1 %v571_v50  ;;  %v592_v9 = vld [vmem:[%s1972_s3 + $0xf0] sm:$0xff]  ;;  %v47_v10 = vld [vmem:[%s1971_s0 + $0xa0] sm:$0xff]  ;;  %v50_v11 = vld [vmem:[%s1971_s0 + $0xb8] sm:$0xff] }
  0x1a   :  { %265 = vmatprep.subr.mxu0 %v98_v25  ;;  %1075 = vmatprep.subr.mxu1 %v1133_v37  ;;  %v591_v12 = vld [vmem:[%s1972_s3 + $0xe8] sm:$0xff]  ;;  %v590_v13 = vld [vmem:[%s1972_s3 + $0xe0] sm:$0xff]  ;;  %v49_v14 = vld [vmem:[%s1971_s0 + $0xb0] sm:$0xff] }
  0x1b   :  { %266 = vmatpush1.msra.mxu0 %v97_v26  ;;  %1107 = vmatpush1.msra.mxu1 %v570_v51  ;;  %v52_v15 = vld [vmem:[%s1971_s0 + $0xc8] sm:$0xff]  ;;  %v589_v16 = vld [vmem:[%s1972_s3 + $0xd8] sm:$0xff]  ;;  %v51_v17 = vld [vmem:[%s1971_s0 + $0xc0] sm:$0xff] }
  0x1c   :  { %267 = vmatprep.subr.mxu0 %v96_v27  ;;  %1076 = vmatprep.subr.mxu1 %v1133_v37  ;;  %v54_v18 = vld [vmem:[%s1971_s0 + $0xd8] sm:$0xff]  ;;  %v588_v19 = vld [vmem:[%s1972_s3 + $0xd0] sm:$0xff]  ;;  %v587_v20 = vld [vmem:[%s1972_s3 + $0xc8] sm:$0xff] }
  0x1d   :  { %268 = vmatpush1.msra.mxu0 %v95_v28  ;;  %1108 = vmatpush1.msra.mxu1 %v569_v54  ;;  %v53_v21 = vld [vmem:[%s1971_s0 + $0xd0] sm:$0xff]  ;;  %v56_v22 = vld [vmem:[%s1971_s0 + $0xe8] sm:$0xff]  ;;  %v586_v23 = vld [vmem:[%s1972_s3 + $0xc0] sm:$0xff] }
  0x1e   :  { %269 = vmatprep.subr.mxu0 %v94_v29  ;;  %1077 = vmatprep.subr.mxu1 %v1133_v37  ;;  %v55_v24 = vld [vmem:[%s1971_s0 + $0xe0] sm:$0xff]  ;;  %v58_v25 = vld [vmem:[%s1971_s0 + $0xf8] sm:$0xff]  ;;  %v584_v27 = vld [vmem:[%s1972_s3 + $0xb0] sm:$0xff] }
  0x1f   :  { %270 = vmatpush1.msra.mxu0 %v93_v30  ;;  %1109 = vmatpush1.msra.mxu1 %v568_v55  ;;  %v585_v26 = vld [vmem:[%s1972_s3 + $0xb8] sm:$0xff]  ;;  %v57_v28 = vld [vmem:[%s1971_s0 + $0xf0] sm:$0xff]  ;;  %v60_v29 = vld [vmem:[%s1971_s0 + $0x108] sm:$0xff] }
  0x20   :  { %271 = vmatprep.subr.mxu0 %v92_v31  ;;  %1078 = vmatprep.subr.mxu1 %v1133_v37  ;;  %v583_v30 = vld [vmem:[%s1972_s3 + $0xa8] sm:$0xff]  ;;  %v59_v31 = vld [vmem:[%s1971_s0 + $0x100] sm:$0xff] }
  0x21   :  { %272 = vmatpush1.msra.mxu0 %v91_v32  ;;  %1110 = vmatpush1.msra.mxu1 %v567_v58  ;;  %v62_v32 = vld [vmem:[%s1971_s0 + $0x118] sm:$0xff] }
  0x22   :  { %1032 = vmatprep.subr.msk.mxu0 %vm234_vm1, %v124_v33  ;;  %1079 = vmatprep.subr.mxu1 %v1133_v37  ;;  %v582_v33 = vld [vmem:[%s1972_s3 + $0xa0] sm:$0xff] }
  0x23   :  { %1033 = vmatpush2.msk.msra.mxu0 %vm234_vm1, %v123_v34  ;;  %1111 = vmatpush1.msra.mxu1 %v566_v59  ;;  %v581_v34 = vld [vmem:[%s1972_s3 + $0x98] sm:$0xff] }
  0x24   :  { %306 = vmatmul.mubr.f32.vlgmr.msra.gmra.mxu0 %v27_v35  ;;  %601 = vmatprep.subr.mxu0 %v1133_v37  ;;  %v61_v35 = vld [vmem:[%s1971_s0 + $0x110] sm:$0xff] }
  0x25   :  { %1035 = vmatprep.mubr.msk.f32.mxu0 %vm137_vm0, %v30_v38  ;;  %602 = vmatpush1.msra.mxu0 %v577_v36  ;;  %v64_v36 = vld [vmem:[%s1971_s0 + $0x128] sm:$0xff]  ;;  %v580_v38 = vld [vmem:[%s1972_s3 + $0x90] sm:$0xff] }
  0x26   :  { %603 = vmatprep.subr.mxu0 %v1133_v37  ;;  %1080 = vmatprep.subr.mxu1 %v1133_v37 }
  0x27   :  { %604 = vmatpush1.msra.mxu0 %v576_v39  ;;  %1112 = vmatpush1.msra.mxu1 %v565_v62  ;;  %v63_v39 = vld [vmem:[%s1971_s0 + $0x120] sm:$0xff] }
  0x28   :  { %312 = vmatmul.mubr.f32.gmra.mxu0 %v29_v40  ;;  %605 = vmatprep.subr.mxu0 %v1133_v37  ;;  %v66_v40 = vld [vmem:[%s1971_s0 + $0x138] sm:$0xff] }
  0x29   :  { %1036 = vmatprep.mubr.msk.f32.mxu0 %vm137_vm0, %v32_v41  ;;  %606 = vmatpush1.msra.mxu0 %v575_v42  ;;  %v579_v41 = vld [vmem:[%s1972_s3 + $0x88] sm:$0xff]  ;;  %v578_v42 = vld [vmem:[%s1972_s3 + $0x80] sm:$0xff] }
  0x2a   :  { %607 = vmatprep.subr.mxu0 %v1133_v37  ;;  %1081 = vmatprep.subr.mxu1 %v1133_v37 }
  0x2b   :  { %608 = vmatpush1.msra.mxu0 %v574_v43  ;;  %1113 = vmatpush1.msra.mxu1 %v564_v63  ;;  %v65_v43 = vld [vmem:[%s1971_s0 + $0x130] sm:$0xff] }
  0x2c   :  { %318 = vmatmul.mubr.f32.gmra.mxu0 %v31_v44  ;;  %609 = vmatprep.subr.mxu0 %v1133_v37  ;;  %v68_v44 = vld [vmem:[%s1971_s0 + $0x148] sm:$0xff] }
  0x2d   :  { %1037 = vmatprep.mubr.msk.f32.mxu0 %vm137_vm0, %v34_v45  ;;  %610 = vmatpush1.msra.mxu0 %v573_v46  ;;  %v67_v45 = vld [vmem:[%s1971_s0 + $0x140] sm:$0xff]  ;;  %v70_v46 = vld [vmem:[%s1971_s0 + $0x158] sm:$0xff] }
  0x2e   :  { %611 = vmatprep.subr.mxu0 %v1133_v37  ;;  %1082 = vmatprep.subr.mxu1 %v1133_v37 }
  0x2f   :  { %612 = vmatpush1.msra.mxu0 %v572_v47  ;;  %1114 = vmatpush1.msra.mxu1 %v563_v2  ;;  %v69_v47 = vld [vmem:[%s1971_s0 + $0x150] sm:$0xff] }
  0x30   :  { %324 = vmatmul.mubr.f32.gmra.mxu0 %v33_v48  ;;  %613 = vmatprep.subr.mxu0 %v1133_v37  ;;  %v72_v48 = vld [vmem:[%s1971_s0 + $0x168] sm:$0xff] }
  0x31   :  { %1038 = vmatprep.mubr.msk.f32.mxu0 %vm137_vm0, %v36_v49  ;;  %614 = vmatpush1.msra.mxu0 %v571_v50  ;;  %v71_v49 = vld [vmem:[%s1971_s0 + $0x160] sm:$0xff]  ;;  %v74_v50 = vld [vmem:[%s1971_s0 + $0x178] sm:$0xff] }
  0x32   :  { %615 = vmatprep.subr.mxu0 %v1133_v37  ;;  %1083 = vmatprep.subr.mxu1 %v1133_v37 }
  0x33   :  { %616 = vmatpush1.msra.mxu0 %v570_v51  ;;  %1115 = vmatpush1.msra.mxu1 %v562_v5  ;;  %v73_v51 = vld [vmem:[%s1971_s0 + $0x170] sm:$0xff] }
  0x34   :  { %330 = vmatmul.mubr.f32.gmra.mxu0 %v35_v52  ;;  %617 = vmatprep.subr.mxu0 %v1133_v37  ;;  %v76_v52 = vld [vmem:[%s1971_s0 + $0x188] sm:$0xff] }
  0x35   :  { %1039 = vmatprep.mubr.msk.f32.mxu0 %vm137_vm0, %v38_v53  ;;  %618 = vmatpush1.msra.mxu0 %v569_v54  ;;  %v78_v53 = vld [vmem:[%s1971_s0 + $0x198] sm:$0xff]  ;;  %v77_v54 = vld [vmem:[%s1971_s0 + $0x190] sm:$0xff] }
  0x36   :  { %619 = vmatprep.subr.mxu0 %v1133_v37  ;;  %1084 = vmatprep.subr.mxu1 %v1133_v37 }
  0x37   :  { %620 = vmatpush1.msra.mxu0 %v568_v55  ;;  %1116 = vmatpush2.msra.mxu1 %v593_v6  ;;  %v80_v55 = vld [vmem:[%s1971_s0 + $0x1a8] sm:$0xff] }
  0x38   :  { %336 = vmatmul.mubr.f32.gmra.mxu0 %v37_v56  ;;  %621 = vmatprep.subr.mxu0 %v1133_v37  ;;  %v79_v56 = vld [vmem:[%s1971_s0 + $0x1a0] sm:$0xff] }
  0x39   :  { %1040 = vmatprep.mubr.msk.f32.mxu0 %vm137_vm0, %v40_v57  ;;  %622 = vmatpush1.msra.mxu0 %v567_v58  ;;  %v82_v57 = vld [vmem:[%s1971_s0 + $0x1b8] sm:$0xff]  ;;  %v81_v58 = vld [vmem:[%s1971_s0 + $0x1b0] sm:$0xff] }
  0x3a   :  { %623 = vmatprep.subr.mxu0 %v1133_v37  ;;  %1085 = vmatprep.subr.mxu1 %v1133_v37 }
  0x3b   :  { %624 = vmatpush1.msra.mxu0 %v566_v59  ;;  %1117 = vmatpush2.msra.mxu1 %v592_v9  ;;  %v84_v59 = vld [vmem:[%s1971_s0 + $0x1c8] sm:$0xff] }
  0x3c   :  { %342 = vmatmul.mubr.f32.gmra.mxu0 %v39_v60  ;;  %625 = vmatprep.subr.mxu0 %v1133_v37  ;;  %v83_v60 = vld [vmem:[%s1971_s0 + $0x1c0] sm:$0xff] }
  0x3d   :  { %1041 = vmatprep.mubr.msk.f32.mxu0 %vm137_vm0, %v42_v61  ;;  %626 = vmatpush1.msra.mxu0 %v565_v62  ;;  %v86_v61 = vld [vmem:[%s1971_s0 + $0x1d8] sm:$0xff]  ;;  %v85_v62 = vld [vmem:[%s1971_s0 + $0x1d0] sm:$0xff] }
  0x3e   :  { %627 = vmatprep.subr.mxu0 %v1133_v37  ;;  %1086 = vmatprep.subr.mxu1 %v1133_v37 }
  0x3f   :  { %628 = vmatpush1.msra.mxu0 %v564_v63  ;;  %1118 = vmatpush2.msra.mxu1 %v591_v12  ;;  %v88_v63 = vld [vmem:[%s1971_s0 + $0x1e8] sm:$0xff] }
  0x40   :  { %348 = vmatmul.mubr.f32.gmra.mxu0 %v41_v0  ;;  %629 = vmatprep.subr.mxu0 %v1133_v37  ;;  %v87_v0 = vld [vmem:[%s1971_s0 + $0x1e0] sm:$0xff] }
  0x41   :  { %1042 = vmatprep.mubr.msk.f32.mxu0 %vm137_vm0, %v44_v1  ;;  %630 = vmatpush1.msra.mxu0 %v563_v2  ;;  %v90_v1 = vld [vmem:[%s1971_s0 + $0x1f8] sm:$0xff]  ;;  %v89_v2 = vld [vmem:[%s1971_s0 + $0x1f0] sm:$0xff] }
  0x42   :  { %631 = vmatprep.subr.mxu0 %v1133_v37  ;;  %1087 = vmatprep.subr.mxu1 %v1133_v37 }
  0x43   :  { %632 = vmatpush1.msra.mxu0 %v562_v5  ;;  %1119 = vmatpush2.msra.mxu1 %v590_v13 }
  0x44   :  { %354 = vmatmul.mubr.f32.gmra.mxu0 %v43_v3  ;;  %633 = vmatprep.subr.mxu0 %v1133_v37  ;;  %v127_v3 = vlaneseq }
  0x45   :  { %1043 = vmatprep.mubr.msk.f32.mxu0 %vm137_vm0, %v46_v4  ;;  %634 = vmatpush2.msra.mxu0 %v593_v6  ;;  %v125_v6 = vld [vmem:[%s1973_s2] sm:$0x3] }
  0x46   :  { %635 = vmatprep.subr.mxu0 %v1133_v37  ;;  %1088 = vmatprep.subr.mxu1 %v1133_v37  ;;  %v128_v4 = vshrl.u32 %v127_v3, 7 }
  0x47   :  { %636 = vmatpush2.msra.mxu0 %v592_v9  ;;  %1120 = vmatpush2.msra.mxu1 %v589_v16 }
  0x48   :  { %360 = vmatmul.mubr.f32.gmra.mxu0 %v45_v7  ;;  %637 = vmatprep.subr.mxu0 %v1133_v37  ;;  %v129_v5 = vsub.s32 0, %v128_v4  ;;  %v133_v7 = vsub.s32 1, %v128_v4 }
  0x49   :  { %1044 = vmatprep.mubr.msk.f32.mxu0 %vm137_vm0, %v48_v8  ;;  %638 = vmatpush2.msra.mxu0 %v591_v12 }
  0x4a   :  { %639 = vmatprep.subr.mxu0 %v1133_v37  ;;  %1089 = vmatprep.subr.mxu1 %v1133_v37  ;;  %v1663_v8 = vrot.slane %v125_v6, %v129_v5  ;;  %v1665_v9 = vrot.slane %v125_v6, %v133_v7 }
  0x4b   :  { %640 = vmatpush2.msra.mxu0 %v590_v13  ;;  %1121 = vmatpush2.msra.mxu1 %v588_v19 }
  0x4c   :  { %366 = vmatmul.mubr.f32.gmra.mxu0 %v47_v10  ;;  %641 = vmatprep.subr.mxu0 %v1133_v37 }
  0x4d   :  { %1045 = vmatprep.mubr.msk.f32.mxu0 %vm137_vm0, %v50_v11  ;;  %642 = vmatpush2.msra.mxu0 %v589_v16 }
  0x4e   :  { %643 = vmatprep.subr.mxu0 %v1133_v37  ;;  %1090 = vmatprep.subr.mxu1 %v1133_v37 }
  0x4f   :  { %644 = vmatpush2.msra.mxu0 %v588_v19  ;;  %1122 = vmatpush2.msra.mxu1 %v587_v20 }
  0x50   :  { %372 = vmatmul.mubr.f32.gmra.mxu0 %v49_v14  ;;  %645 = vmatprep.subr.mxu0 %v1133_v37 }
  0x51   :  { %1046 = vmatprep.mubr.msk.f32.mxu0 %vm137_vm0, %v52_v15  ;;  %646 = vmatpush2.msra.mxu0 %v587_v20 }
  0x52   :  { %647 = vmatprep.subr.mxu0 %v1133_v37  ;;  %1091 = vmatprep.subr.mxu1 %v1133_v37 }
  0x53   :  { %648 = vmatpush2.msra.mxu0 %v586_v23  ;;  %1123 = vmatpush2.msra.mxu1 %v586_v23 }
  0x54   :  { %378 = vmatmul.mubr.f32.gmra.mxu0 %v51_v17  ;;  %649 = vmatprep.subr.mxu0 %v1133_v37 }
  0x55   :  { %1047 = vmatprep.mubr.msk.f32.mxu0 %vm137_vm0, %v54_v18  ;;  %650 = vmatpush2.msra.mxu0 %v585_v26 }
  0x56   :  { %651 = vmatprep.subr.mxu0 %v1133_v37  ;;  %1092 = vmatprep.subr.mxu1 %v1133_v37 }
  0x57   :  { %652 = vmatpush2.msra.mxu0 %v584_v27  ;;  %1124 = vmatpush2.msra.mxu1 %v585_v26 }
  0x58   :  { %384 = vmatmul.mubr.f32.gmra.mxu0 %v53_v21  ;;  %653 = vmatprep.subr.mxu0 %v1133_v37 }
  0x59   :  { %1048 = vmatprep.mubr.msk.f32.mxu0 %vm137_vm0, %v56_v22  ;;  %654 = vmatpush2.msra.mxu0 %v583_v30 }
  0x5a   :  { %655 = vmatprep.subr.mxu0 %v1133_v37  ;;  %1093 = vmatprep.subr.mxu1 %v1133_v37 }
  0x5b   :  { %656 = vmatpush2.msra.mxu0 %v582_v33  ;;  %1125 = vmatpush2.msra.mxu1 %v584_v27 }
  0x5c   :  { %390 = vmatmul.mubr.f32.gmra.mxu0 %v55_v24  ;;  %657 = vmatprep.subr.mxu0 %v1133_v37 }
  0x5d   :  { %1049 = vmatprep.mubr.msk.f32.mxu0 %vm137_vm0, %v58_v25  ;;  %658 = vmatpush2.msra.mxu0 %v581_v34 }
  0x5e   :  { %659 = vmatprep.subr.mxu0 %v1133_v37  ;;  %1094 = vmatprep.subr.mxu1 %v1133_v37 }
  0x5f   :  { %660 = vmatpush2.msra.mxu0 %v580_v38  ;;  %1126 = vmatpush2.msra.mxu1 %v583_v30 }
  0x60   :  { %396 = vmatmul.mubr.f32.gmra.mxu0 %v57_v28  ;;  %661 = vmatprep.subr.mxu0 %v1133_v37 }
  0x61   :  { %1050 = vmatprep.mubr.msk.f32.mxu0 %vm137_vm0, %v60_v29  ;;  %662 = vmatpush2.msra.mxu0 %v579_v41 }
  0x62   :  { %663 = vmatprep.subr.mxu0 %v1133_v37  ;;  %1095 = vmatprep.subr.mxu1 %v1133_v37 }
  0x63   :  { %664 = vmatpush2.msra.mxu0 %v578_v42  ;;  %1127 = vmatpush2.msra.mxu1 %v582_v33 }
  0x64   :  { %402 = vmatmul.mubr.f32.gmra.mxu0 %v59_v31  ;;  %1096 = vmatprep.subr.mxu1 %v1133_v37 }
  0x65   :  { %1051 = vmatprep.mubr.msk.f32.mxu0 %vm137_vm0, %v62_v32  ;;  %1128 = vmatpush2.msra.mxu1 %v581_v34 }
  0x66   :  { %1097 = vmatprep.subr.mxu1 %v1133_v37 }
  0x67   :  { %1129 = vmatpush2.msra.mxu1 %v580_v38 }
  0x68   :  { %408 = vmatmul.mubr.f32.gmra.mxu0 %v61_v35  ;;  %1098 = vmatprep.subr.mxu1 %v1133_v37 }
  0x69   :  { %1052 = vmatprep.mubr.msk.f32.mxu0 %vm137_vm0, %v64_v36  ;;  %1130 = vmatpush2.msra.mxu1 %v579_v41 }
  0x6a   :  { %1099 = vmatprep.subr.mxu1 %v1133_v37  ;;  %v75_v37 = vld [vmem:[%s1971_s0 + $0x180] sm:$0xff] }
  0x6b   :  { %1131 = vmatpush2.msra.mxu1 %v578_v42 }
  0x6c   :  { %414 = vmatmul.mubr.f32.gmra.mxu0 %v63_v39 }
  0x6d   :  { %1053 = vmatprep.mubr.msk.f32.mxu0 %vm137_vm0, %v66_v40 }
  0x70   :  { %420 = vmatmul.mubr.f32.gmra.mxu0 %v65_v43 }
  0x71   :  { %1054 = vmatprep.mubr.msk.f32.mxu0 %vm137_vm0, %v68_v44 }
  0x74   :  { %426 = vmatmul.mubr.f32.gmra.mxu0 %v67_v45 }
  0x75   :  { %1055 = vmatprep.mubr.msk.f32.mxu0 %vm137_vm0, %v70_v46 }
  0x78   :  { %432 = vmatmul.mubr.f32.gmra.mxu0 %v69_v47 }
  0x79   :  { %1056 = vmatprep.mubr.msk.f32.mxu0 %vm137_vm0, %v72_v48 }
  0x7c   :  { %438 = vmatmul.mubr.f32.gmra.mxu0 %v71_v49 }
  0x7d   :  { %1057 = vmatprep.mubr.msk.f32.mxu0 %vm137_vm0, %v74_v50 }
  0x80   :  { %444 = vmatmul.mubr.f32.gmra.mxu0 %v73_v51 }
  0x81   :  { %1058 = vmatprep.mubr.msk.f32.mxu0 %vm137_vm0, %v76_v52 }
  0x84   :  { %450 = vmatmul.mubr.f32.gmra.mxu0 %v75_v37 }
  0x85   :  { %1059 = vmatprep.mubr.msk.f32.mxu0 %vm137_vm0, %v78_v53 }
  0x88   :  { %456 = vmatmul.mubr.f32.gmra.mxu0 %v77_v54 }
  0x89   :  { %1060 = vmatprep.mubr.msk.f32.mxu0 %vm137_vm0, %v80_v55 }
  0x8c   :  { %462 = vmatmul.mubr.f32.gmra.mxu0 %v79_v56 }
  0x8d   :  { %1061 = vmatprep.mubr.msk.f32.mxu0 %vm137_vm0, %v82_v57 }
  0x90   :  { %468 = vmatmul.mubr.f32.gmra.mxu0 %v81_v58 }
  0x91   :  { %1062 = vmatprep.mubr.msk.f32.mxu0 %vm137_vm0, %v84_v59 }
  0x94   :  { %474 = vmatmul.mubr.f32.gmra.mxu0 %v83_v60 }
  0x95   :  { %1063 = vmatprep.mubr.msk.f32.mxu0 %vm137_vm0, %v86_v61 }
  0x98   :  { %480 = vmatmul.mubr.f32.gmra.mxu0 %v85_v62 }
  0x99   :  { %1064 = vmatprep.mubr.msk.f32.mxu0 %vm137_vm0, %v88_v63 }
  0x9c   :  { %486 = vmatmul.mubr.f32.gmra.mxu0 %v87_v0 }
  0x9d   :  { %1065 = vmatprep.mubr.msk.f32.mxu0 %vm137_vm0, %v90_v1 }
  0xa0   :  { %492 = vmatmul.mubr.f32.gmra.mxu0 %v89_v2 }
  0xe4   :  { %v307_v10 = vpop.f32.mrf.mxu0 }
  0xe5   :  { %v308_v11 = vadd.f32 %v307_v10, %v1663_v8 }
  0xe6   :  { %v309_v12 = vpop.f32.mrf.mxu0 }
  0xe7   :  { %v310_v13 = vadd.f32 %v309_v12, %v1665_v9  ;;  %v498_v16 = vmax.f32 %v308_v11, 0.0 }
  0xe8   :  { %v313_v14 = vpop.f32.mrf.mxu0 }
  0xe9   :  { %v499_v15 = vmax.f32 %v310_v13, 0.0  ;;  %v314_v17 = vadd.f32 %v313_v14, %v1663_v8 }
  0xea   :  { %v315_v18 = vpop.f32.mrf.mxu0 }
  0xeb   :  { %v316_v19 = vadd.f32 %v315_v18, %v1665_v9  ;;  %665 = vmatprep.mubr.f32.mxu0 %v499_v15  ;;  %v500_v22 = vmax.f32 %v314_v17, 0.0 }
  0xec   :  { %v319_v20 = vpop.f32.mrf.mxu0  ;;  %666 = vmatmul.mubr.f32.vlgmr.msra.gmra.mxu0 %v498_v16 }
  0xed   :  { %v501_v21 = vmax.f32 %v316_v19, 0.0  ;;  %v320_v23 = vadd.f32 %v319_v20, %v1663_v8 }
  0xee   :  { %v321_v24 = vpop.f32.mrf.mxu0 }
  0xef   :  { %v322_v25 = vadd.f32 %v321_v24, %v1665_v9  ;;  %670 = vmatprep.mubr.f32.mxu0 %v501_v21  ;;  %v502_v28 = vmax.f32 %v320_v23, 0.0 }
  0xf0   :  { %v325_v26 = vpop.f32.mrf.mxu0  ;;  %671 = vmatmul.mubr.f32.gmra.mxu0 %v500_v22 }
  0xf1   :  { %v503_v27 = vmax.f32 %v322_v25, 0.0  ;;  %v326_v29 = vadd.f32 %v325_v26, %v1663_v8 }
  0xf2   :  { %v327_v30 = vpop.f32.mrf.mxu0 }
  0xf3   :  { %675 = vmatprep.mubr.f32.mxu0 %v503_v27  ;;  %v328_v31 = vadd.f32 %v327_v30, %v1665_v9  ;;  %v504_v34 = vmax.f32 %v326_v29, 0.0 }
  0xf4   :  { %v331_v32 = vpop.f32.mrf.mxu0  ;;  %676 = vmatmul.mubr.f32.gmra.mxu0 %v502_v28 }
  0xf5   :  { %v505_v33 = vmax.f32 %v328_v31, 0.0  ;;  %v332_v35 = vadd.f32 %v331_v32, %v1663_v8 }
  0xf6   :  { %v333_v36 = vpop.f32.mrf.mxu0 }
  0xf7   :  { %v334_v38 = vadd.f32 %v333_v36, %v1665_v9  ;;  %680 = vmatprep.mubr.f32.mxu1 %v505_v33  ;;  %v506_v41 = vmax.f32 %v332_v35, 0.0 }
  0xf8   :  { %v337_v39 = vpop.f32.mrf.mxu0  ;;  %681 = vmatmul.mubr.f32.vlgmr.msra.gmra.mxu1 %v504_v34 }
  0xf9   :  { %v507_v40 = vmax.f32 %v334_v38, 0.0  ;;  %v338_v42 = vadd.f32 %v337_v39, %v1663_v8 }
  0xfa   :  { %v339_v43 = vpop.f32.mrf.mxu0 }
  0xfb   :  { %v340_v44 = vadd.f32 %v339_v43, %v1665_v9  ;;  %685 = vmatprep.mubr.f32.mxu1 %v507_v40  ;;  %v508_v47 = vmax.f32 %v338_v42, 0.0 }
  0xfc   :  { %v343_v45 = vpop.f32.mrf.mxu0  ;;  %686 = vmatmul.mubr.f32.gmra.mxu1 %v506_v41 }
  0xfd   :  { %v509_v46 = vmax.f32 %v340_v44, 0.0  ;;  %v344_v48 = vadd.f32 %v343_v45, %v1663_v8 }
  0xfe   :  { %v345_v49 = vpop.f32.mrf.mxu0 }
  0xff   :  { %v346_v50 = vadd.f32 %v345_v49, %v1665_v9  ;;  %690 = vmatprep.mubr.f32.mxu1 %v509_v46  ;;  %v510_v37 = vmax.f32 %v344_v48, 0.0 }
 0x100   :  { %v349_v51 = vpop.f32.mrf.mxu0  ;;  %691 = vmatmul.mubr.f32.gmra.mxu1 %v508_v47 }
 0x101   :  { %v511_v52 = vmax.f32 %v346_v50, 0.0  ;;  %v350_v53 = vadd.f32 %v349_v51, %v1663_v8 }
 0x102   :  { %v351_v54 = vpop.f32.mrf.mxu0 }
 0x103   :  { %v352_v55 = vadd.f32 %v351_v54, %v1665_v9  ;;  %695 = vmatprep.mubr.f32.mxu1 %v511_v52  ;;  %v512_v58 = vmax.f32 %v350_v53, 0.0 }
 0x104   :  { %v355_v56 = vpop.f32.mrf.mxu0  ;;  %696 = vmatmul.mubr.f32.gmra.mxu1 %v510_v37 }
 0x105   :  { %v513_v57 = vmax.f32 %v352_v55, 0.0  ;;  %v356_v59 = vadd.f32 %v355_v56, %v1663_v8 }
 0x106   :  { %v357_v60 = vpop.f32.mrf.mxu0 }
 0x107   :  { %v358_v61 = vadd.f32 %v357_v60, %v1665_v9  ;;  %700 = vmatprep.mubr.f32.mxu1 %v513_v57  ;;  %v514_v0 = vmax.f32 %v356_v59, 0.0 }
 0x108   :  { %v361_v62 = vpop.f32.mrf.mxu0  ;;  %701 = vmatmul.mubr.f32.gmra.mxu1 %v512_v58 }
 0x109   :  { %v515_v63 = vmax.f32 %v358_v61, 0.0  ;;  %v362_v1 = vadd.f32 %v361_v62, %v1663_v8 }
 0x10a   :  { %v363_v2 = vpop.f32.mrf.mxu0 }
 0x10b   :  { %v364_v3 = vadd.f32 %v363_v2, %v1665_v9  ;;  %705 = vmatprep.mubr.f32.mxu1 %v515_v63  ;;  %v516_v6 = vmax.f32 %v362_v1, 0.0 }
 0x10c   :  { %v367_v4 = vpop.f32.mrf.mxu0  ;;  %706 = vmatmul.mubr.f32.gmra.mxu1 %v514_v0 }
 0x10d   :  { %v517_v5 = vmax.f32 %v364_v3, 0.0  ;;  %v368_v7 = vadd.f32 %v367_v4, %v1663_v8 }
 0x10e   :  { %v369_v10 = vpop.f32.mrf.mxu0 }
 0x10f   :  { %v370_v11 = vadd.f32 %v369_v10, %v1665_v9  ;;  %710 = vmatprep.mubr.f32.mxu1 %v517_v5  ;;  %v518_v14 = vmax.f32 %v368_v7, 0.0 }
 0x110   :  { %v373_v12 = vpop.f32.mrf.mxu0  ;;  %711 = vmatmul.mubr.f32.gmra.mxu1 %v516_v6 }
 0x111   :  { %v519_v13 = vmax.f32 %v370_v11, 0.0  ;;  %v374_v15 = vadd.f32 %v373_v12, %v1663_v8 }
 0x112   :  { %v375_v16 = vpop.f32.mrf.mxu0 }
 0x113   :  { %v376_v17 = vadd.f32 %v375_v16, %v1665_v9  ;;  %715 = vmatprep.mubr.f32.mxu1 %v519_v13  ;;  %v520_v20 = vmax.f32 %v374_v15, 0.0 }
 0x114   :  { %v379_v18 = vpop.f32.mrf.mxu0  ;;  %716 = vmatmul.mubr.f32.gmra.mxu1 %v518_v14 }
 0x115   :  { %v521_v19 = vmax.f32 %v376_v17, 0.0  ;;  %v380_v21 = vadd.f32 %v379_v18, %v1663_v8 }
 0x116   :  { %v381_v22 = vpop.f32.mrf.mxu0 }
 0x117   :  { %v382_v23 = vadd.f32 %v381_v22, %v1665_v9  ;;  %720 = vmatprep.mubr.f32.mxu1 %v521_v19  ;;  %v522_v26 = vmax.f32 %v380_v21, 0.0 }
 0x118   :  { %v385_v24 = vpop.f32.mrf.mxu0  ;;  %721 = vmatmul.mubr.f32.gmra.mxu1 %v520_v20 }
 0x119   :  { %v523_v25 = vmax.f32 %v382_v23, 0.0  ;;  %v386_v27 = vadd.f32 %v385_v24, %v1663_v8 }
 0x11a   :  { %v387_v28 = vpop.f32.mrf.mxu0 }
 0x11b   :  { %v388_v29 = vadd.f32 %v387_v28, %v1665_v9  ;;  %725 = vmatprep.mubr.f32.mxu1 %v523_v25  ;;  %v524_v32 = vmax.f32 %v386_v27, 0.0 }
 0x11c   :  { %v391_v30 = vpop.f32.mrf.mxu0  ;;  %726 = vmatmul.mubr.f32.gmra.mxu1 %v522_v26 }
 0x11d   :  { %v525_v31 = vmax.f32 %v388_v29, 0.0  ;;  %v392_v33 = vadd.f32 %v391_v30, %v1663_v8 }
 0x11e   :  { %v393_v34 = vpop.f32.mrf.mxu0 }
 0x11f   :  { %v394_v35 = vadd.f32 %v393_v34, %v1665_v9  ;;  %730 = vmatprep.mubr.f32.mxu1 %v525_v31  ;;  %v526_v39 = vmax.f32 %v392_v33, 0.0 }
 0x120   :  { %v397_v36 = vpop.f32.mrf.mxu0  ;;  %731 = vmatmul.mubr.f32.gmra.mxu1 %v524_v32 }
 0x121   :  { %v527_v38 = vmax.f32 %v394_v35, 0.0  ;;  %v398_v40 = vadd.f32 %v397_v36, %v1663_v8 }
 0x122   :  { %v399_v41 = vpop.f32.mrf.mxu0 }
 0x123   :  { %v400_v42 = vadd.f32 %v399_v41, %v1665_v9  ;;  %735 = vmatprep.mubr.f32.mxu1 %v527_v38  ;;  %v528_v45 = vmax.f32 %v398_v40, 0.0 }
 0x124   :  { %v403_v43 = vpop.f32.mrf.mxu0  ;;  %736 = vmatmul.mubr.f32.gmra.mxu1 %v526_v39 }
 0x125   :  { %v529_v44 = vmax.f32 %v400_v42, 0.0  ;;  %v404_v46 = vadd.f32 %v403_v43, %v1663_v8 }
 0x126   :  { %v405_v47 = vpop.f32.mrf.mxu0 }
 0x127   :  { %v406_v48 = vadd.f32 %v405_v47, %v1665_v9  ;;  %740 = vmatprep.mubr.f32.mxu1 %v529_v44  ;;  %v530_v51 = vmax.f32 %v404_v46, 0.0 }
 0x128   :  { %v409_v49 = vpop.f32.mrf.mxu0  ;;  %741 = vmatmul.mubr.f32.gmra.mxu1 %v528_v45 }
 0x129   :  { %v531_v50 = vmax.f32 %v406_v48, 0.0  ;;  %v410_v52 = vadd.f32 %v409_v49, %v1663_v8 }
 0x12a   :  { %v411_v37 = vpop.f32.mrf.mxu0 }
 0x12b   :  { %v412_v53 = vadd.f32 %v411_v37, %v1665_v9  ;;  %745 = vmatprep.mubr.f32.mxu1 %v531_v50  ;;  %v532_v56 = vmax.f32 %v410_v52, 0.0 }
 0x12c   :  { %v415_v54 = vpop.f32.mrf.mxu0  ;;  %746 = vmatmul.mubr.f32.gmra.mxu1 %v530_v51 }
 0x12d   :  { %v533_v55 = vmax.f32 %v412_v53, 0.0  ;;  %v416_v57 = vadd.f32 %v415_v54, %v1663_v8 }
 0x12e   :  { %v417_v58 = vpop.f32.mrf.mxu0 }
 0x12f   :  { %v418_v59 = vadd.f32 %v417_v58, %v1665_v9  ;;  %750 = vmatprep.mubr.f32.mxu1 %v533_v55  ;;  %v534_v62 = vmax.f32 %v416_v57, 0.0 }
 0x130   :  { %v421_v60 = vpop.f32.mrf.mxu0  ;;  %751 = vmatmul.mubr.f32.gmra.mxu1 %v532_v56 }
 0x131   :  { %v535_v61 = vmax.f32 %v418_v59, 0.0  ;;  %v422_v63 = vadd.f32 %v421_v60, %v1663_v8 }
 0x132   :  { %v423_v0 = vpop.f32.mrf.mxu0 }
 0x133   :  { %v424_v1 = vadd.f32 %v423_v0, %v1665_v9  ;;  %755 = vmatprep.mubr.f32.mxu1 %v535_v61  ;;  %v536_v4 = vmax.f32 %v422_v63, 0.0 }
 0x134   :  { %v427_v2 = vpop.f32.mrf.mxu0  ;;  %756 = vmatmul.mubr.f32.gmra.mxu1 %v534_v62 }
 0x135   :  { %v537_v3 = vmax.f32 %v424_v1, 0.0  ;;  %v428_v5 = vadd.f32 %v427_v2, %v1663_v8 }
 0x136   :  { %v429_v6 = vpop.f32.mrf.mxu0 }
 0x137   :  { %v430_v7 = vadd.f32 %v429_v6, %v1665_v9  ;;  %760 = vmatprep.mubr.f32.mxu1 %v537_v3  ;;  %v538_v12 = vmax.f32 %v428_v5, 0.0 }
 0x138   :  { %v433_v10 = vpop.f32.mrf.mxu0  ;;  %761 = vmatmul.mubr.f32.gmra.mxu1 %v536_v4 }
 0x139   :  { %v539_v11 = vmax.f32 %v430_v7, 0.0  ;;  %v434_v13 = vadd.f32 %v433_v10, %v1663_v8 }
 0x13a   :  { %v435_v14 = vpop.f32.mrf.mxu0 }
 0x13b   :  { %v436_v15 = vadd.f32 %v435_v14, %v1665_v9  ;;  %765 = vmatprep.mubr.f32.mxu1 %v539_v11  ;;  %v540_v18 = vmax.f32 %v434_v13, 0.0 }
 0x13c   :  { %v439_v16 = vpop.f32.mrf.mxu0  ;;  %766 = vmatmul.mubr.f32.gmra.mxu1 %v538_v12 }
 0x13d   :  { %v541_v17 = vmax.f32 %v436_v15, 0.0  ;;  %v440_v19 = vadd.f32 %v439_v16, %v1663_v8  ;;  %v1734_v16 = vld [vmem:[%s1974_s4] ss:$0 sm:$0xff] }
 0x13e   :  { %v441_v20 = vpop.f32.mrf.mxu0 }
 0x13f   :  { %v442_v21 = vadd.f32 %v441_v20, %v1665_v9  ;;  %770 = vmatprep.mubr.f32.mxu1 %v541_v17  ;;  %v542_v24 = vmax.f32 %v440_v19, 0.0 }
 0x140   :  { %v445_v22 = vpop.f32.mrf.mxu0  ;;  %771 = vmatmul.mubr.f32.gmra.mxu1 %v540_v18 }
 0x141   :  { %v543_v23 = vmax.f32 %v442_v21, 0.0  ;;  %v446_v25 = vadd.f32 %v445_v22, %v1663_v8 }
 0x142   :  { %v447_v26 = vpop.f32.mrf.mxu0 }
 0x143   :  { %v448_v27 = vadd.f32 %v447_v26, %v1665_v9  ;;  %775 = vmatprep.mubr.f32.mxu1 %v543_v23  ;;  %v544_v30 = vmax.f32 %v446_v25, 0.0 }
 0x144   :  { %v451_v28 = vpop.f32.mrf.mxu0  ;;  %776 = vmatmul.mubr.f32.gmra.mxu1 %v542_v24 }
 0x145   :  { %v545_v29 = vmax.f32 %v448_v27, 0.0  ;;  %v452_v31 = vadd.f32 %v451_v28, %v1663_v8 }
 0x146   :  { %v453_v32 = vpop.f32.mrf.mxu0 }
 0x147   :  { %v454_v33 = vadd.f32 %v453_v32, %v1665_v9  ;;  %780 = vmatprep.mubr.f32.mxu1 %v545_v29  ;;  %v546_v36 = vmax.f32 %v452_v31, 0.0 }
 0x148   :  { %v457_v34 = vpop.f32.mrf.mxu0  ;;  %781 = vmatmul.mubr.f32.gmra.mxu1 %v544_v30 }
 0x149   :  { %v547_v35 = vmax.f32 %v454_v33, 0.0  ;;  %v458_v38 = vadd.f32 %v457_v34, %v1663_v8 }
 0x14a   :  { %v459_v39 = vpop.f32.mrf.mxu0 }
 0x14b   :  { %v460_v40 = vadd.f32 %v459_v39, %v1665_v9  ;;  %785 = vmatprep.mubr.f32.mxu1 %v547_v35  ;;  %v548_v43 = vmax.f32 %v458_v38, 0.0 }
 0x14c   :  { %v463_v41 = vpop.f32.mrf.mxu0  ;;  %786 = vmatmul.mubr.f32.gmra.mxu1 %v546_v36 }
 0x14d   :  { %v549_v42 = vmax.f32 %v460_v40, 0.0  ;;  %v464_v44 = vadd.f32 %v463_v41, %v1663_v8 }
 0x14e   :  { %v465_v45 = vpop.f32.mrf.mxu0 }
 0x14f   :  { %v466_v46 = vadd.f32 %v465_v45, %v1665_v9  ;;  %790 = vmatprep.mubr.f32.mxu1 %v549_v42  ;;  %v550_v49 = vmax.f32 %v464_v44, 0.0 }
 0x150   :  { %v469_v47 = vpop.f32.mrf.mxu0  ;;  %791 = vmatmul.mubr.f32.gmra.mxu1 %v548_v43 }
 0x151   :  { %v551_v48 = vmax.f32 %v466_v46, 0.0  ;;  %v470_v50 = vadd.f32 %v469_v47, %v1663_v8 }
 0x152   :  { %v471_v51 = vpop.f32.mrf.mxu0 }
 0x153   :  { %v472_v52 = vadd.f32 %v471_v51, %v1665_v9  ;;  %795 = vmatprep.mubr.f32.mxu1 %v551_v48  ;;  %v552_v54 = vmax.f32 %v470_v50, 0.0 }
 0x154   :  { %v475_v37 = vpop.f32.mrf.mxu0  ;;  %796 = vmatmul.mubr.f32.gmra.mxu1 %v550_v49 }
 0x155   :  { %v553_v53 = vmax.f32 %v472_v52, 0.0  ;;  %v476_v55 = vadd.f32 %v475_v37, %v1663_v8 }
 0x156   :  { %v477_v56 = vpop.f32.mrf.mxu0 }
 0x157   :  { %v478_v57 = vadd.f32 %v477_v56, %v1665_v9  ;;  %800 = vmatprep.mubr.f32.mxu1 %v553_v53  ;;  %v554_v60 = vmax.f32 %v476_v55, 0.0 }
 0x158   :  { %v481_v58 = vpop.f32.mrf.mxu0  ;;  %801 = vmatmul.mubr.f32.gmra.mxu1 %v552_v54 }
 0x159   :  { %v555_v59 = vmax.f32 %v478_v57, 0.0  ;;  %v482_v61 = vadd.f32 %v481_v58, %v1663_v8 }
 0x15a   :  { %v483_v62 = vpop.f32.mrf.mxu0 }
 0x15b   :  { %v484_v63 = vadd.f32 %v483_v62, %v1665_v9  ;;  %805 = vmatprep.mubr.f32.mxu1 %v555_v59  ;;  %v556_v2 = vmax.f32 %v482_v61, 0.0 }
 0x15c   :  { %v487_v0 = vpop.f32.mrf.mxu0  ;;  %806 = vmatmul.mubr.f32.gmra.mxu1 %v554_v60 }
 0x15d   :  { %v557_v1 = vmax.f32 %v484_v63, 0.0  ;;  %v488_v3 = vadd.f32 %v487_v0, %v1663_v8 }
 0x15e   :  { %v489_v4 = vpop.f32.mrf.mxu0 }
 0x15f   :  { %v490_v5 = vadd.f32 %v489_v4, %v1665_v9  ;;  %810 = vmatprep.mubr.f32.mxu1 %v557_v1  ;;  %v558_v10 = vmax.f32 %v488_v3, 0.0 }
 0x160   :  { %v493_v6 = vpop.f32.mrf.mxu0  ;;  %811 = vmatmul.mubr.f32.gmra.mxu1 %v556_v2 }
 0x161   :  { %v559_v7 = vmax.f32 %v490_v5, 0.0  ;;  %v494_v11 = vadd.f32 %v493_v6, %v1663_v8  ;;  %v1740_v8 = vld [vmem:[%s1975_s5] ss:$0 sm:$0xff] }
 0x162   :  { %v495_v12 = vpop.f32.mrf.mxu0 }
 0x163   :  { %v496_v13 = vadd.f32 %v495_v12, %v1665_v9  ;;  %815 = vmatprep.mubr.f32.mxu1 %v559_v7  ;;  %v560_v15 = vmax.f32 %v494_v11, 0.0 }
 0x164   :  { %816 = vmatmul.mubr.f32.gmra.mxu1 %v558_v10 }
 0x165   :  { %v561_v14 = vmax.f32 %v496_v13, 0.0 }
 0x167   :  { %820 = vmatprep.mubr.f32.mxu1 %v561_v14 }
 0x168   :  { %821 = vmatmul.mubr.f32.gmra.mxu1 %v560_v15 }
 0x1ac   :  { %v667_v17 = vpop.f32.mrf.mxu0 }
 0x1ad   :  { %v668_v18 = vadd.f32 %v1734_v16, %v667_v17 }
 0x1ae   :  { %v669_v19 = vpop.f32.mrf.mxu0 }
 0x1af   :  { %v826_v9 = vmax.f32 %v668_v18, 0.0 }
 0x1b0   :  { %v672_v20 = vpop.f32.mrf.mxu0 }
 0x1b1   :  { %v673_v21 = vadd.f32 %v1734_v16, %v672_v20  ;;  %v865_v22 = vmul.f32 %v1740_v8, %v826_v9 }
 0x1b2   :  { %v674_v23 = vpop.f32.mrf.mxu0 }
 0x1b3   :  { %v827_v24 = vmax.f32 %v673_v21, 0.0  ;;  %897 = vadd.xlane.f32.xlu0 %v865_v22 }
 0x1b4   :  { %v677_v25 = vpop.f32.mrf.mxu0 }
 0x1b5   :  { %v678_v26 = vadd.f32 %v1734_v16, %v677_v25  ;;  %v866_v27 = vmul.f32 %v1740_v8, %v827_v24 }
 0x1b6   :  { %v679_v28 = vpop.f32.mrf.mxu0 }
 0x1b7   :  { %v828_v29 = vmax.f32 %v678_v26, 0.0  ;;  %899 = vadd.xlane.f32.xlu0 %v866_v27 }
 0x1b8   :  { %v682_v30 = vpop.f32.mrf.mxu1 }
 0x1b9   :  { %v683_v31 = vadd.f32 %v1734_v16, %v682_v30  ;;  %v867_v32 = vmul.f32 %v1740_v8, %v828_v29 }
 0x1ba   :  { %v684_v33 = vpop.f32.mrf.mxu1 }
 0x1bb   :  { %v829_v34 = vmax.f32 %v683_v31, 0.0  ;;  %901 = vadd.xlane.f32.xlu1 %v867_v32 }
 0x1bc   :  { %v687_v35 = vpop.f32.mrf.mxu1 }
 0x1bd   :  { %v688_v36 = vadd.f32 %v1734_v16, %v687_v35  ;;  %v868_v38 = vmul.f32 %v1740_v8, %v829_v34 }
 0x1be   :  { %v689_v39 = vpop.f32.mrf.mxu1 }
 0x1bf   :  { %v830_v40 = vmax.f32 %v688_v36, 0.0  ;;  %903 = vadd.xlane.f32.xlu1 %v868_v38 }
 0x1c0   :  { %v692_v41 = vpop.f32.mrf.mxu1 }
 0x1c1   :  { %v693_v42 = vadd.f32 %v1734_v16, %v692_v41  ;;  %v869_v43 = vmul.f32 %v1740_v8, %v830_v40 }
 0x1c2   :  { %v694_v44 = vpop.f32.mrf.mxu1 }
 0x1c3   :  { %v831_v45 = vmax.f32 %v693_v42, 0.0  ;;  %905 = vadd.xlane.f32.xlu0 %v869_v43 }
 0x1c4   :  { %v697_v46 = vpop.f32.mrf.mxu1 }
 0x1c5   :  { %v698_v47 = vadd.f32 %v1734_v16, %v697_v46  ;;  %v870_v48 = vmul.f32 %v1740_v8, %v831_v45 }
 0x1c6   :  { %v699_v49 = vpop.f32.mrf.mxu1 }
 0x1c7   :  { %v832_v50 = vmax.f32 %v698_v47, 0.0  ;;  %907 = vadd.xlane.f32.xlu1 %v870_v48 }
 0x1c8   :  { %v702_v51 = vpop.f32.mrf.mxu1 }
 0x1c9   :  { %v703_v52 = vadd.f32 %v1734_v16, %v702_v51  ;;  %v871_v37 = vmul.f32 %v1740_v8, %v832_v50 }
 0x1ca   :  { %v704_v53 = vpop.f32.mrf.mxu1 }
 0x1cb   :  { %v833_v54 = vmax.f32 %v703_v52, 0.0  ;;  %909 = vadd.xlane.f32.xlu0 %v871_v37 }
 0x1cc   :  { %v707_v55 = vpop.f32.mrf.mxu1 }
 0x1cd   :  { %v708_v56 = vadd.f32 %v1734_v16, %v707_v55  ;;  %v872_v57 = vmul.f32 %v1740_v8, %v833_v54 }
 0x1ce   :  { %v709_v58 = vpop.f32.mrf.mxu1 }
 0x1cf   :  { %v834_v59 = vmax.f32 %v708_v56, 0.0  ;;  %911 = vadd.xlane.f32.xlu1 %v872_v57 }
 0x1d0   :  { %v712_v60 = vpop.f32.mrf.mxu1 }
 0x1d1   :  { %v713_v61 = vadd.f32 %v1734_v16, %v712_v60  ;;  %v873_v62 = vmul.f32 %v1740_v8, %v834_v59 }
 0x1d2   :  { %v714_v63 = vpop.f32.mrf.mxu1 }
 0x1d3   :  { %v835_v0 = vmax.f32 %v713_v61, 0.0  ;;  %913 = vadd.xlane.f32.xlu0 %v873_v62 }
 0x1d4   :  { %v717_v1 = vpop.f32.mrf.mxu1 }
 0x1d5   :  { %v718_v2 = vadd.f32 %v1734_v16, %v717_v1  ;;  %v874_v3 = vmul.f32 %v1740_v8, %v835_v0 }
 0x1d6   :  { %v719_v4 = vpop.f32.mrf.mxu1 }
 0x1d7   :  { %v836_v5 = vmax.f32 %v718_v2, 0.0  ;;  %915 = vadd.xlane.f32.xlu1 %v874_v3 }
 0x1d8   :  { %v722_v6 = vpop.f32.mrf.mxu1 }
 0x1d9   :  { %v723_v7 = vadd.f32 %v1734_v16, %v722_v6  ;;  %v875_v10 = vmul.f32 %v1740_v8, %v836_v5 }
 0x1da   :  { %v724_v11 = vpop.f32.mrf.mxu1 }
 0x1db   :  { %v837_v12 = vmax.f32 %v723_v7, 0.0  ;;  %917 = vadd.xlane.f32.xlu0 %v875_v10 }
 0x1dc   :  { %v727_v13 = vpop.f32.mrf.mxu1 }
 0x1dd   :  { %v728_v14 = vadd.f32 %v1734_v16, %v727_v13  ;;  %v876_v15 = vmul.f32 %v1740_v8, %v837_v12 }
 0x1de   :  { %v729_v17 = vpop.f32.mrf.mxu1 }
 0x1df   :  { %v838_v18 = vmax.f32 %v728_v14, 0.0  ;;  %919 = vadd.xlane.f32.xlu1 %v876_v15 }
 0x1e0   :  { %v732_v19 = vpop.f32.mrf.mxu1 }
 0x1e1   :  { %v733_v9 = vadd.f32 %v1734_v16, %v732_v19  ;;  %v877_v20 = vmul.f32 %v1740_v8, %v838_v18 }
 0x1e2   :  { %v734_v21 = vpop.f32.mrf.mxu1 }
 0x1e3   :  { %v839_v22 = vmax.f32 %v733_v9, 0.0  ;;  %921 = vadd.xlane.f32.xlu0 %v877_v20 }
 0x1e4   :  { %v737_v23 = vpop.f32.mrf.mxu1 }
 0x1e5   :  { %v738_v24 = vadd.f32 %v1734_v16, %v737_v23  ;;  %v878_v25 = vmul.f32 %v1740_v8, %v839_v22 }
 0x1e6   :  { %v739_v26 = vpop.f32.mrf.mxu1 }
 0x1e7   :  { %v840_v27 = vmax.f32 %v738_v24, 0.0  ;;  %923 = vadd.xlane.f32.xlu1 %v878_v25 }
 0x1e8   :  { %v742_v28 = vpop.f32.mrf.mxu1 }
 0x1e9   :  { %v743_v29 = vadd.f32 %v1734_v16, %v742_v28  ;;  %v879_v30 = vmul.f32 %v1740_v8, %v840_v27 }
 0x1ea   :  { %v744_v31 = vpop.f32.mrf.mxu1 }
 0x1eb   :  { %v841_v32 = vmax.f32 %v743_v29, 0.0  ;;  %925 = vadd.xlane.f32.xlu0 %v879_v30 }
 0x1ec   :  { %v747_v33 = vpop.f32.mrf.mxu1 }
 0x1ed   :  { %v748_v34 = vadd.f32 %v1734_v16, %v747_v33  ;;  %v880_v35 = vmul.f32 %v1740_v8, %v841_v32 }
 0x1ee   :  { %v749_v36 = vpop.f32.mrf.mxu1 }
 0x1ef   :  { %v842_v38 = vmax.f32 %v748_v34, 0.0  ;;  %927 = vadd.xlane.f32.xlu1 %v880_v35 }
 0x1f0   :  { %v752_v39 = vpop.f32.mrf.mxu1 }
 0x1f1   :  { %v753_v40 = vadd.f32 %v1734_v16, %v752_v39  ;;  %v881_v41 = vmul.f32 %v1740_v8, %v842_v38 }
 0x1f2   :  { %v754_v42 = vpop.f32.mrf.mxu1 }
 0x1f3   :  { %v843_v43 = vmax.f32 %v753_v40, 0.0  ;;  %929 = vadd.xlane.f32.xlu0 %v881_v41 }
 0x1f4   :  { %v757_v44 = vpop.f32.mrf.mxu1 }
 0x1f5   :  { %v758_v45 = vadd.f32 %v1734_v16, %v757_v44  ;;  %v882_v46 = vmul.f32 %v1740_v8, %v843_v43 }
 0x1f6   :  { %v759_v47 = vpop.f32.mrf.mxu1 }
 0x1f7   :  { %v844_v48 = vmax.f32 %v758_v45, 0.0  ;;  %931 = vadd.xlane.f32.xlu1 %v882_v46 }
 0x1f8   :  { %v762_v49 = vpop.f32.mrf.mxu1 }
 0x1f9   :  { %v763_v50 = vadd.f32 %v1734_v16, %v762_v49  ;;  %v883_v51 = vmul.f32 %v1740_v8, %v844_v48 }
 0x1fa   :  { %v764_v52 = vpop.f32.mrf.mxu1 }
 0x1fb   :  { %v845_v37 = vmax.f32 %v763_v50, 0.0  ;;  %933 = vadd.xlane.f32.xlu0 %v883_v51 }
 0x1fc   :  { %v767_v53 = vpop.f32.mrf.mxu1 }
 0x1fd   :  { %v768_v54 = vadd.f32 %v1734_v16, %v767_v53  ;;  %v884_v55 = vmul.f32 %v1740_v8, %v845_v37  ;;  %v1808_v37 = vstv %s1976_s6 }
 0x1fe   :  { %v769_v56 = vpop.f32.mrf.mxu1 }
 0x1ff   :  { %v846_v57 = vmax.f32 %v768_v54, 0.0  ;;  %935 = vadd.xlane.f32.xlu1 %v884_v55 }
 0x200   :  { %v772_v58 = vpop.f32.mrf.mxu1 }
 0x201   :  { %v773_v59 = vadd.f32 %v1734_v16, %v772_v58  ;;  %v885_v60 = vmul.f32 %v1740_v8, %v846_v57 }
 0x202   :  { %v774_v61 = vpop.f32.mrf.mxu1 }
 0x203   :  { %v847_v62 = vmax.f32 %v773_v59, 0.0  ;;  %937 = vadd.xlane.f32.xlu0 %v885_v60 }
 0x204   :  { %v777_v63 = vpop.f32.mrf.mxu1 }
 0x205   :  { %v778_v0 = vadd.f32 %v1734_v16, %v777_v63  ;;  %v886_v1 = vmul.f32 %v1740_v8, %v847_v62 }
 0x206   :  { %v779_v2 = vpop.f32.mrf.mxu1 }
 0x207   :  { %v848_v3 = vmax.f32 %v778_v0, 0.0  ;;  %939 = vadd.xlane.f32.xlu1 %v886_v1 }
 0x208   :  { %v782_v4 = vpop.f32.mrf.mxu1 }
 0x209   :  { %v783_v5 = vadd.f32 %v1734_v16, %v782_v4  ;;  %v887_v6 = vmul.f32 %v1740_v8, %v848_v3 }
 0x20a   :  { %v784_v7 = vpop.f32.mrf.mxu1 }
 0x20b   :  { %v849_v10 = vmax.f32 %v783_v5, 0.0  ;;  %941 = vadd.xlane.f32.xlu0 %v887_v6 }
 0x20c   :  { %v787_v11 = vpop.f32.mrf.mxu1 }
 0x20d   :  { %v788_v12 = vadd.f32 %v1734_v16, %v787_v11  ;;  %v888_v13 = vmul.f32 %v1740_v8, %v849_v10 }
 0x20e   :  { %v789_v14 = vpop.f32.mrf.mxu1 }
 0x20f   :  { %v850_v15 = vmax.f32 %v788_v12, 0.0  ;;  %943 = vadd.xlane.f32.xlu1 %v888_v13 }
 0x210   :  { %v792_v17 = vpop.f32.mrf.mxu1 }
 0x211   :  { %v793_v18 = vadd.f32 %v1734_v16, %v792_v17  ;;  %v889_v19 = vmul.f32 %v1740_v8, %v850_v15 }
 0x212   :  { %v794_v9 = vpop.f32.mrf.mxu1 }
 0x213   :  { %v851_v20 = vmax.f32 %v793_v18, 0.0  ;;  %945 = vadd.xlane.f32.xlu0 %v889_v19 }
 0x214   :  { %v797_v21 = vpop.f32.mrf.mxu1 }
 0x215   :  { %v798_v22 = vadd.f32 %v1734_v16, %v797_v21  ;;  %v890_v23 = vmul.f32 %v1740_v8, %v851_v20 }
 0x216   :  { %v799_v24 = vpop.f32.mrf.mxu1 }
 0x217   :  { %v852_v25 = vmax.f32 %v798_v22, 0.0  ;;  %947 = vadd.xlane.f32.xlu1 %v890_v23 }
 0x218   :  { %v802_v26 = vpop.f32.mrf.mxu1 }
 0x219   :  { %v803_v27 = vadd.f32 %v1734_v16, %v802_v26  ;;  %v891_v28 = vmul.f32 %v1740_v8, %v852_v25 }
 0x21a   :  { %v804_v29 = vpop.f32.mrf.mxu1 }
 0x21b   :  { %v853_v30 = vmax.f32 %v803_v27, 0.0  ;;  %949 = vadd.xlane.f32.xlu0 %v891_v28 }
 0x21c   :  { %v807_v31 = vpop.f32.mrf.mxu1 }
 0x21d   :  { %v808_v32 = vadd.f32 %v1734_v16, %v807_v31  ;;  %v892_v33 = vmul.f32 %v1740_v8, %v853_v30 }
 0x21e   :  { %v809_v34 = vpop.f32.mrf.mxu1 }
 0x21f   :  { %v854_v35 = vmax.f32 %v808_v32, 0.0  ;;  %951 = vadd.xlane.f32.xlu1 %v892_v33 }
 0x220   :  { %v812_v36 = vpop.f32.mrf.mxu1 }
 0x221   :  { %v813_v38 = vadd.f32 %v1734_v16, %v812_v36  ;;  %v893_v39 = vmul.f32 %v1740_v8, %v854_v35 }
 0x222   :  { %v814_v40 = vpop.f32.mrf.mxu1 }
 0x223   :  { %v855_v41 = vmax.f32 %v813_v38, 0.0  ;;  %953 = vadd.xlane.f32.xlu0 %v893_v39 }
 0x224   :  { %v817_v42 = vpop.f32.mrf.mxu1 }
 0x225   :  { %v818_v43 = vadd.f32 %v1734_v16, %v817_v42  ;;  %v894_v44 = vmul.f32 %v1740_v8, %v855_v41 }
 0x226   :  { %v819_v45 = vpop.f32.mrf.mxu1 }
 0x227   :  { %v856_v46 = vmax.f32 %v818_v43, 0.0  ;;  %955 = vadd.xlane.f32.xlu1 %v894_v44 }
 0x228   :  { %v822_v47 = vpop.f32.mrf.mxu1 }
 0x229   :  { %v823_v48 = vadd.f32 %v1734_v16, %v822_v47  ;;  %v895_v49 = vmul.f32 %v1740_v8, %v856_v46 }
 0x22a   :  { %v824_v50 = vpop.f32.mrf.mxu1 }
 0x22b   :  { %v857_v51 = vmax.f32 %v823_v48, 0.0  ;;  %957 = vadd.xlane.f32.xlu0 %v895_v49 }
 0x22d   :  { %v896_v52 = vmul.f32 %v1740_v8, %v857_v51 }
 0x22f   :  { %959 = vadd.xlane.f32.xlu1 %v896_v52 }
 0x23c   :  { %v898_v53 = vpop.xlane.xlu0 %897 }
 0x23d   :  { %v963_v54 = vadd.f32 %v1808_v37, %v898_v53 }
 0x23f   :  { %996 = vst.msk [vmem:[%s1977_s7] sm:$0xff] %vm995_vm2, %v963_v54 }
 0x240   :  { %v900_v16 = vpop.xlane.xlu0 %899 }
 0x241   :  { %v964_v55 = vadd.f32 %v1808_v37, %v900_v16 }
 0x243   :  { %997 = vst.msk [vmem:[%s1977_s7 + $0x8] sm:$0xff] %vm995_vm2, %v964_v55 }
 0x244   :  { %v902_v8 = vpop.xlane.xlu1 %901 }
 0x245   :  { %v965_v56 = vadd.f32 %v1808_v37, %v902_v8 }
 0x247   :  { %998 = vst.msk [vmem:[%s1977_s7 + $0x10] sm:$0xff] %vm995_vm2, %v965_v56 }
 0x248   :  { %v904_v57 = vpop.xlane.xlu1 %903 }
 0x249   :  { %v966_v58 = vadd.f32 %v1808_v37, %v904_v57 }
 0x24b   :  { %999 = vst.msk [vmem:[%s1977_s7 + $0x18] sm:$0xff] %vm995_vm2, %v966_v58 }
 0x24c   :  { %v906_v59 = vpop.xlane.xlu0 %905 }
 0x24d   :  { %v967_v60 = vadd.f32 %v1808_v37, %v906_v59 }
 0x24f   :  { %1000 = vst.msk [vmem:[%s1977_s7 + $0x20] sm:$0xff] %vm995_vm2, %v967_v60 }
 0x250   :  { %v908_v61 = vpop.xlane.xlu1 %907 }
 0x251   :  { %v968_v62 = vadd.f32 %v1808_v37, %v908_v61 }
 0x253   :  { %1001 = vst.msk [vmem:[%s1977_s7 + $0x28] sm:$0xff] %vm995_vm2, %v968_v62 }
 0x254   :  { %v910_v63 = vpop.xlane.xlu0 %909 }
 0x255   :  { %v969_v0 = vadd.f32 %v1808_v37, %v910_v63 }
 0x257   :  { %1002 = vst.msk [vmem:[%s1977_s7 + $0x30] sm:$0xff] %vm995_vm2, %v969_v0 }
 0x258   :  { %v912_v1 = vpop.xlane.xlu1 %911 }
 0x259   :  { %v970_v2 = vadd.f32 %v1808_v37, %v912_v1 }
 0x25b   :  { %1003 = vst.msk [vmem:[%s1977_s7 + $0x38] sm:$0xff] %vm995_vm2, %v970_v2 }
 0x25c   :  { %v914_v3 = vpop.xlane.xlu0 %913 }
 0x25d   :  { %v971_v4 = vadd.f32 %v1808_v37, %v914_v3 }
 0x25f   :  { %1004 = vst.msk [vmem:[%s1977_s7 + $0x40] sm:$0xff] %vm995_vm2, %v971_v4 }
 0x260   :  { %v916_v5 = vpop.xlane.xlu1 %915 }
 0x261   :  { %v972_v6 = vadd.f32 %v1808_v37, %v916_v5 }
 0x263   :  { %1005 = vst.msk [vmem:[%s1977_s7 + $0x48] sm:$0xff] %vm995_vm2, %v972_v6 }
 0x264   :  { %v918_v7 = vpop.xlane.xlu0 %917 }
 0x265   :  { %v973_v10 = vadd.f32 %v1808_v37, %v918_v7 }
 0x267   :  { %1006 = vst.msk [vmem:[%s1977_s7 + $0x50] sm:$0xff] %vm995_vm2, %v973_v10 }
 0x268   :  { %v920_v11 = vpop.xlane.xlu1 %919 }
 0x269   :  { %v974_v12 = vadd.f32 %v1808_v37, %v920_v11 }
 0x26b   :  { %1007 = vst.msk [vmem:[%s1977_s7 + $0x58] sm:$0xff] %vm995_vm2, %v974_v12 }
 0x26c   :  { %v922_v13 = vpop.xlane.xlu0 %921 }
 0x26d   :  { %v975_v14 = vadd.f32 %v1808_v37, %v922_v13 }
 0x26f   :  { %1008 = vst.msk [vmem:[%s1977_s7 + $0x60] sm:$0xff] %vm995_vm2, %v975_v14 }
 0x270   :  { %v924_v15 = vpop.xlane.xlu1 %923 }
 0x271   :  { %v976_v17 = vadd.f32 %v1808_v37, %v924_v15 }
 0x273   :  { %1009 = vst.msk [vmem:[%s1977_s7 + $0x68] sm:$0xff] %vm995_vm2, %v976_v17 }
 0x274   :  { %v926_v18 = vpop.xlane.xlu0 %925 }
 0x275   :  { %v977_v19 = vadd.f32 %v1808_v37, %v926_v18 }
 0x277   :  { %1010 = vst.msk [vmem:[%s1977_s7 + $0x70] sm:$0xff] %vm995_vm2, %v977_v19 }
 0x278   :  { %v928_v9 = vpop.xlane.xlu1 %927 }
 0x279   :  { %v978_v20 = vadd.f32 %v1808_v37, %v928_v9 }
 0x27b   :  { %1011 = vst.msk [vmem:[%s1977_s7 + $0x78] sm:$0xff] %vm995_vm2, %v978_v20 }
 0x27c   :  { %v930_v21 = vpop.xlane.xlu0 %929 }
 0x27d   :  { %v979_v22 = vadd.f32 %v1808_v37, %v930_v21 }
 0x27f   :  { %1012 = vst.msk [vmem:[%s1977_s7 + $0x80] sm:$0xff] %vm995_vm2, %v979_v22 }
 0x280   :  { %v932_v23 = vpop.xlane.xlu1 %931 }
 0x281   :  { %v980_v24 = vadd.f32 %v1808_v37, %v932_v23 }
 0x283   :  { %1013 = vst.msk [vmem:[%s1977_s7 + $0x88] sm:$0xff] %vm995_vm2, %v980_v24 }
 0x284   :  { %v934_v25 = vpop.xlane.xlu0 %933 }
 0x285   :  { %v981_v26 = vadd.f32 %v1808_v37, %v934_v25 }
 0x287   :  { %1014 = vst.msk [vmem:[%s1977_s7 + $0x90] sm:$0xff] %vm995_vm2, %v981_v26 }
 0x288   :  { %v936_v27 = vpop.xlane.xlu1 %935 }
 0x289   :  { %v982_v28 = vadd.f32 %v1808_v37, %v936_v27 }
 0x28b   :  { %1015 = vst.msk [vmem:[%s1977_s7 + $0x98] sm:$0xff] %vm995_vm2, %v982_v28 }
 0x28c   :  { %v938_v29 = vpop.xlane.xlu0 %937 }
 0x28d   :  { %v983_v30 = vadd.f32 %v1808_v37, %v938_v29 }
 0x28f   :  { %1016 = vst.msk [vmem:[%s1977_s7 + $0xa0] sm:$0xff] %vm995_vm2, %v983_v30 }
 0x290   :  { %v940_v31 = vpop.xlane.xlu1 %939 }
 0x291   :  { %v984_v32 = vadd.f32 %v1808_v37, %v940_v31 }
 0x293   :  { %1017 = vst.msk [vmem:[%s1977_s7 + $0xa8] sm:$0xff] %vm995_vm2, %v984_v32 }
 0x294   :  { %v942_v33 = vpop.xlane.xlu0 %941 }
 0x295   :  { %v985_v34 = vadd.f32 %v1808_v37, %v942_v33 }
 0x297   :  { %1018 = vst.msk [vmem:[%s1977_s7 + $0xb0] sm:$0xff] %vm995_vm2, %v985_v34 }
 0x298   :  { %v944_v35 = vpop.xlane.xlu1 %943 }
 0x299   :  { %v986_v36 = vadd.f32 %v1808_v37, %v944_v35 }
 0x29b   :  { %1019 = vst.msk [vmem:[%s1977_s7 + $0xb8] sm:$0xff] %vm995_vm2, %v986_v36 }
 0x29c   :  { %v946_v38 = vpop.xlane.xlu0 %945 }
 0x29d   :  { %v987_v39 = vadd.f32 %v1808_v37, %v946_v38 }
 0x29f   :  { %1020 = vst.msk [vmem:[%s1977_s7 + $0xc0] sm:$0xff] %vm995_vm2, %v987_v39 }
 0x2a0   :  { %v948_v40 = vpop.xlane.xlu1 %947 }
 0x2a1   :  { %v988_v41 = vadd.f32 %v1808_v37, %v948_v40 }
 0x2a3   :  { %1021 = vst.msk [vmem:[%s1977_s7 + $0xc8] sm:$0xff] %vm995_vm2, %v988_v41 }
 0x2a4   :  { %v950_v42 = vpop.xlane.xlu0 %949 }
 0x2a5   :  { %v989_v43 = vadd.f32 %v1808_v37, %v950_v42 }
 0x2a7   :  { %1022 = vst.msk [vmem:[%s1977_s7 + $0xd0] sm:$0xff] %vm995_vm2, %v989_v43 }
 0x2a8   :  { %v952_v44 = vpop.xlane.xlu1 %951 }
 0x2a9   :  { %v990_v45 = vadd.f32 %v1808_v37, %v952_v44 }
 0x2ab   :  { %1023 = vst.msk [vmem:[%s1977_s7 + $0xd8] sm:$0xff] %vm995_vm2, %v990_v45 }
 0x2ac   :  { %v954_v46 = vpop.xlane.xlu0 %953 }
 0x2ad   :  { %v991_v47 = vadd.f32 %v1808_v37, %v954_v46 }
 0x2af   :  { %1024 = vst.msk [vmem:[%s1977_s7 + $0xe0] sm:$0xff] %vm995_vm2, %v991_v47 }
 0x2b0   :  { %v956_v48 = vpop.xlane.xlu1 %955 }
 0x2b1   :  { %v992_v49 = vadd.f32 %v1808_v37, %v956_v48 }
 0x2b3   :  { %1025 = vst.msk [vmem:[%s1977_s7 + $0xe8] sm:$0xff] %vm995_vm2, %v992_v49 }
 0x2b4   :  { %v958_v50 = vpop.xlane.xlu0 %957 }
 0x2b5   :  { %v993_v51 = vadd.f32 %v1808_v37, %v958_v50 }
 0x2b7   :  { %1026 = vst.msk [vmem:[%s1977_s7 + $0xf0] sm:$0xff] %vm995_vm2, %v993_v51 }
 0x2b8   :  { %v960_v52 = vpop.xlane.xlu1 %959 }
 0x2b9   :  { %v994_v53 = vadd.f32 %v1808_v37, %v960_v52 }
 0x2bb   :  { %1027 = vst.msk [vmem:[%s1977_s7 + $0xf8] sm:$0xff] %vm995_vm2, %v994_v53 }

</bundles_post_ra>
